<compile_context>
chip_gen: v7x
topology: tpu7x:2x2x1
jax: 0.10.0
libtpu: 0.0.40
codegen_flags: <defaults>
</compile_context>

<pallas_src>
import functools

import jax
import jax.numpy as jnp
from jax.experimental import pallas as pl
from jax.experimental.pallas import tpu as pltpu

# ----------------------------- model config ---------------------------------
TASK_NAMES = ["class_biglips", "class_smiling", "class_male", "class_young"]
TASK_NAME = "class_biglips"
NUM_CLASSES = 2          # binary attribute -> 2 logits per task
C_IN = 3                 # RGB
C_FEAT = 8               # backbone feature channels
KH = KW = 3              # conv kernel size


# ------------------------------- kernel --------------------------------------
def _multitask_kernel(patches_ref, wconv_ref, bconv_ref, pool_ref,
                      whead_ref, bhead_ref, out_ref):
    """Whole batch in a single step (lane-dense layout).

    patches_ref : (27, N*H*W)        im2col'd input, positions on the lane axis
    wconv_ref   : (C_FEAT, 27)       conv weights, flattened (kh,kw,c) and transposed
    bconv_ref   : (C_FEAT, 1)
    pool_ref    : (N*H*W, N)         block "ones" matrix -> per-image spatial sum
    whead_ref   : (NUM_CLASSES, C_FEAT)  selected-task head, pre-scaled by 1/(H*W)
    bhead_ref   : (NUM_CLASSES, 1)
    out_ref     : (NUM_CLASSES, N)   task logits (transposed)
    """
    # conv as a single matmul: (8, 27) @ (27, N*H*W) -> lane-dense (8, N*H*W)
    feat = jnp.dot(wconv_ref[...], patches_ref[...],
                   preferred_element_type=jnp.float32)
    feat = jnp.maximum(feat + bconv_ref[...], 0.0)            # bias + ReLU

    # global average pool per image as a matmul (mean scale folded into head)
    pooled = jnp.dot(feat, pool_ref[...],
                     preferred_element_type=jnp.float32)       # (C_FEAT, N)

    # selected-task head only: (2, 8) @ (8, N) + (2, 1)
    logits_t = jnp.dot(whead_ref[...], pooled,
                       preferred_element_type=jnp.float32) + bhead_ref[...]
    out_ref[...] = logits_t.astype(out_ref.dtype)              # (2, N)


# ------------------------------- wrapper --------------------------------------
def task_specific_forward(x_nchw, params, task_name=TASK_NAME):
    """TaskSpecificModel.forward: run multitask model, return the selected task's logits."""
    w_conv, b_conv, w_heads, b_heads = params
    n, cin, h, w = x_nchw.shape
    hw = h * w
    nq = n * hw
    kk = KH * KW * cin
    t = TASK_NAMES.index(task_name)

    # NCHW -> NHWC, pad spatial by 1 (conv padding=1).
    x_nhwc = jnp.transpose(x_nchw, (0, 2, 3, 1))
    xp = jnp.pad(x_nhwc, ((0, 0), (1, 1), (1, 1), (0, 0)))

    # im2col in XLA: (N, H, W, KH*KW*C_IN) with tap order (kh, kw, c), then
    # transpose so positions are on the lane axis of the kernel input.
    patches = jnp.concatenate(
        [xp[:, kh:kh + h, kw:kw + w, :] for kh in range(KH) for kw in range(KW)],
        axis=-1)                                   # (N, H, W, 27)
    patches_t = patches.reshape(nq, kk).T          # (27, N*H*W)

    wconv_t = w_conv.reshape(kk, C_FEAT).T         # (C_FEAT, 27), same (kh,kw,c) order
    bconv_c = b_conv.reshape(C_FEAT, 1)

    # per-image pooling selector (ones; 1/(H*W) is folded into the head weights)
    pool = (jnp.arange(nq)[:, None] // hw ==
            jnp.arange(n)[None, :]).astype(jnp.float32)        # (N*H*W, N)

    # only the selected task's head, pre-scaled by 1/(H*W)
    w_task = w_heads[:, t * NUM_CLASSES:(t + 1) * NUM_CLASSES] * (1.0 / hw)
    whead_t = w_task.T                                         # (2, C_FEAT)
    bhead_c = b_heads[0, t * NUM_CLASSES:(t + 1) * NUM_CLASSES].reshape(NUM_CLASSES, 1)

    grid_spec = pltpu.PrefetchScalarGridSpec(
        num_scalar_prefetch=0,
        grid=(1,),                                 # whole batch in one step
        in_specs=[
            pl.BlockSpec((kk, nq), lambda i: (0, 0)),
            pl.BlockSpec((C_FEAT, kk), lambda i: (0, 0)),
            pl.BlockSpec((C_FEAT, 1), lambda i: (0, 0)),
            pl.BlockSpec((nq, n), lambda i: (0, 0)),
            pl.BlockSpec((NUM_CLASSES, C_FEAT), lambda i: (0, 0)),
            pl.BlockSpec((NUM_CLASSES, 1), lambda i: (0, 0)),
        ],
        out_specs=pl.BlockSpec((NUM_CLASSES, n), lambda i: (0, 0)),
    )

    out_t = pl.pallas_call(
        _multitask_kernel,
        out_shape=jax.ShapeDtypeStruct((NUM_CLASSES, n), jnp.float32),
        grid_spec=grid_spec,
    )(patches_t, wconv_t, bconv_c, pool, whead_t, bhead_c)

    # TODO(synk): for very large batches (N*H*W im2col >> VMEM), tile the lane
    # axis over a grid and accumulate the pooled features across tiles.
    return out_t.T                                  # (N, NUM_CLASSES)


# ----------------------- pure-JAX reference (for checking) -------------------
def _reference_forward(x_nchw, params, task_name=TASK_NAME):
    w_conv, b_conv, w_heads, b_heads = params
    x = jnp.transpose(x_nchw, (0, 2, 3, 1))
    xp = jnp.pad(x, ((0, 0), (1, 1), (1, 1), (0, 0)))
    n, hp, wp, cin = xp.shape
    h, w = hp - 2, wp - 2
    acc = jnp.zeros((n, h, w, w_conv.shape[-1]), jnp.float32)
    for kh in range(KH):
        for kw in range(KW):
            acc = acc + jnp.einsum("nhwc,cf->nhwf",
                                   xp[:, kh:kh + h, kw:kw + w, :],
                                   w_conv[kh, kw])
    feat = jnp.maximum(acc + b_conv[0], 0.0)
    pooled = jnp.mean(feat, axis=(1, 2))
    logits = pooled @ w_heads + b_heads[0]
    t = TASK_NAMES.index(task_name)
    return logits[:, t * NUM_CLASSES:(t + 1) * NUM_CLASSES]


# ----------------------------- parameter init --------------------------------
def init_params(key):
    k1, k2, k3, k4 = jax.random.split(key, 4)
    t2 = len(TASK_NAMES) * NUM_CLASSES
    w_conv = jax.random.normal(k1, (KH, KW, C_IN, C_FEAT), jnp.float32) * 0.1
    b_conv = jax.random.normal(k2, (1, C_FEAT), jnp.float32) * 0.01
    w_heads = jax.random.normal(k3, (C_FEAT, t2), jnp.float32) * 0.1
    b_heads = jax.random.normal(k4, (1, t2), jnp.float32) * 0.01
    return (w_conv, b_conv, w_heads, b_heads)


if __name__ == "__main__":
    key = jax.random.PRNGKey(0)
    kp, kx = jax.random.split(key)
    params = init_params(kp)

    # Small CelebA-like input: batch=2, RGB, 16x16 spatial (NCHW as in PyTorch).
    x = jax.random.normal(kx, (2, C_IN, 16, 16), jnp.float32)

    forward = jax.jit(functools.partial(task_specific_forward, task_name=TASK_NAME))
    out = forward(x, params)                       # (2, 2) logits for 'class_biglips'
    out = jax.block_until_ready(out)

    ref = _reference_forward(x, params)
    assert out.shape == (2, NUM_CLASSES)
    assert jnp.allclose(out, ref, atol=1e-3, rtol=1e-3), (out, ref)

    print("KERNEL_OK")
</pallas_src>

<mosaic_0001>
module attributes {stable_mosaic.version = 11 : i64} {
  func.func @_multitask_kernel(%arg0: i32, %arg1: memref<27x512xf32, #tpu.memory_space<vmem>>, %arg2: memref<8x27xf32, #tpu.memory_space<vmem>>, %arg3: memref<8x1xf32, #tpu.memory_space<vmem>>, %arg4: memref<512x2xf32, #tpu.memory_space<vmem>>, %arg5: memref<2x8xf32, #tpu.memory_space<vmem>>, %arg6: memref<2x1xf32, #tpu.memory_space<vmem>>, %arg7: memref<2x2xf32, #tpu.memory_space<vmem>>) attributes {dimension_semantics = [#tpu.dimension_semantics<arbitrary>], iteration_bounds = array<i64: 1>, scalar_prefetch = 0 : i64, scratch_operands = 0 : i64, tpu.core_type = #tpu.core_type<tc>, window_params = [{pipeline_mode = #tpu.pipeline_mode<synchronous>, transform_indices = @transform_0, window_bounds = array<i64: 27, 512>}, {pipeline_mode = #tpu.pipeline_mode<synchronous>, transform_indices = @transform_1, window_bounds = array<i64: 8, 27>}, {pipeline_mode = #tpu.pipeline_mode<synchronous>, transform_indices = @transform_2, window_bounds = array<i64: 8, 1>}, {pipeline_mode = #tpu.pipeline_mode<synchronous>, transform_indices = @transform_3, window_bounds = array<i64: 512, 2>}, {pipeline_mode = #tpu.pipeline_mode<synchronous>, transform_indices = @transform_4, window_bounds = array<i64: 2, 8>}, {pipeline_mode = #tpu.pipeline_mode<synchronous>, transform_indices = @transform_5, window_bounds = array<i64: 2, 1>}, {pipeline_mode = #tpu.pipeline_mode<synchronous>, transform_indices = @transform_6, window_bounds = array<i64: 2, 2>}]} {
    %c0 = arith.constant 0 : index
    %c0_0 = arith.constant 0 : index
    %0 = vector.load %arg2[%c0, %c0_0] : memref<8x27xf32, #tpu.memory_space<vmem>>, vector<8x27xf32>
    %c0_1 = arith.constant 0 : index
    %c0_2 = arith.constant 0 : index
    %1 = vector.load %arg1[%c0_1, %c0_2] : memref<27x512xf32, #tpu.memory_space<vmem>>, vector<27x512xf32>
    %cst = arith.constant dense<0.000000e+00> : vector<8x512xf32>
    %2 = tpu.matmul %0, %1, %cst {dimension_numbers = #tpu.dot_dimension_numbers<[1], [0], [0], [1], [0, 0, 1, 1], [], []>} : vector<8x27xf32>, vector<27x512xf32>, vector<8x512xf32> -> vector<8x512xf32>
    %c0_3 = arith.constant 0 : index
    %c0_4 = arith.constant 0 : index
    %3 = vector.load %arg3[%c0_3, %c0_4] : memref<8x1xf32, #tpu.memory_space<vmem>>, vector<8x1xf32>
    %4 = vector.broadcast %3 : vector<8x1xf32> to vector<8x512xf32>
    %5 = arith.addf %2, %4 : vector<8x512xf32>
    %cst_5 = arith.constant 0.000000e+00 : f32
    %6 = vector.broadcast %cst_5 : f32 to vector<8x512xf32>
    %7 = arith.maximumf %5, %6 : vector<8x512xf32>
    %c0_6 = arith.constant 0 : index
    %c0_7 = arith.constant 0 : index
    %8 = vector.load %arg4[%c0_6, %c0_7] : memref<512x2xf32, #tpu.memory_space<vmem>>, vector<512x2xf32>
    %cst_8 = arith.constant dense<0.000000e+00> : vector<8x2xf32>
    %9 = tpu.matmul %7, %8, %cst_8 {dimension_numbers = #tpu.dot_dimension_numbers<[1], [0], [0], [1], [0, 0, 1, 1], [], []>} : vector<8x512xf32>, vector<512x2xf32>, vector<8x2xf32> -> vector<8x2xf32>
    %c0_9 = arith.constant 0 : index
    %c0_10 = arith.constant 0 : index
    %10 = vector.load %arg5[%c0_9, %c0_10] : memref<2x8xf32, #tpu.memory_space<vmem>>, vector<2x8xf32>
    %cst_11 = arith.constant dense<0.000000e+00> : vector<2x2xf32>
    %11 = tpu.matmul %10, %9, %cst_11 {dimension_numbers = #tpu.dot_dimension_numbers<[1], [0], [0], [1], [0, 0, 1, 1], [], []>} : vector<2x8xf32>, vector<8x2xf32>, vector<2x2xf32> -> vector<2x2xf32>
    %c0_12 = arith.constant 0 : index
    %c0_13 = arith.constant 0 : index
    %12 = vector.load %arg6[%c0_12, %c0_13] : memref<2x1xf32, #tpu.memory_space<vmem>>, vector<2x1xf32>
    %13 = vector.broadcast %12 : vector<2x1xf32> to vector<2x2xf32>
    %14 = arith.addf %11, %13 : vector<2x2xf32>
    %c0_14 = arith.constant 0 : index
    %c0_15 = arith.constant 0 : index
    %15 = vector.load %arg7[%c0_14, %c0_15] : memref<2x2xf32, #tpu.memory_space<vmem>>, vector<2x2xf32>
    tpu.vector_store %arg7[%c0_14, %c0_15], %14 {strides = array<i32>} : memref<2x2xf32, #tpu.memory_space<vmem>>, vector<2x2xf32>,
    return
  }
  func.func @transform_0(%arg0: i32) -> (i32, i32) {
    %c0_i32 = arith.constant 0 : i32
    %c0_i32_0 = arith.constant 0 : i32
    %c0_i32_1 = arith.constant 0 : i32
    return %c0_i32, %c0_i32_0 : i32, i32
  }
  func.func @transform_1(%arg0: i32) -> (i32, i32) {
    %c0_i32 = arith.constant 0 : i32
    %c0_i32_0 = arith.constant 0 : i32
    %c0_i32_1 = arith.constant 0 : i32
    return %c0_i32, %c0_i32_0 : i32, i32
  }
  func.func @transform_2(%arg0: i32) -> (i32, i32) {
    %c0_i32 = arith.constant 0 : i32
    %c0_i32_0 = arith.constant 0 : i32
    %c0_i32_1 = arith.constant 0 : i32
    return %c0_i32, %c0_i32_0 : i32, i32
  }
  func.func @transform_3(%arg0: i32) -> (i32, i32) {
    %c0_i32 = arith.constant 0 : i32
    %c0_i32_0 = arith.constant 0 : i32
    %c0_i32_1 = arith.constant 0 : i32
    return %c0_i32, %c0_i32_0 : i32, i32
  }
  func.func @transform_4(%arg0: i32) -> (i32, i32) {
    %c0_i32 = arith.constant 0 : i32
    %c0_i32_0 = arith.constant 0 : i32
    %c0_i32_1 = arith.constant 0 : i32
    return %c0_i32, %c0_i32_0 : i32, i32
  }
  func.func @transform_5(%arg0: i32) -> (i32, i32) {
    %c0_i32 = arith.constant 0 : i32
    %c0_i32_0 = arith.constant 0 : i32
    %c0_i32_1 = arith.constant 0 : i32
    return %c0_i32, %c0_i32_0 : i32, i32
  }
  func.func @transform_6(%arg0: i32) -> (i32, i32) {
    %c0_i32 = arith.constant 0 : i32
    %c0_i32_0 = arith.constant 0 : i32
    %c0_i32_1 = arith.constant 0 : i32
    return %c0_i32, %c0_i32_0 : i32, i32
  }
}

</mosaic_0001>

<bundles_post_ra>
// kernel: task_specific_forward.1
= control target key start
LH: loop header
LB: loop body
LE: loop exit
PB: predicated region body
PF: predicated region fallthrough
CT: control target
= control target key end

     0   :  { %vm50_vm0 = vcmask 1042432   ;;  %v673_v3 = vmov 0.0   ;;  %v674_v8 = vmov 0   ;;  %vm675_vm1 = vmmov 1   ;;  %s986_s0 = inlined_call_operand.vmem [shape: f32[27,512], index: 0, kind: input, shape index: {}]   ;;  %s987_s1 = inlined_call_operand.vmem [shape: f32[8,27], index: 1, kind: input, shape index: {}]   ;;  %s988_s2 = inlined_call_operand.vmem [shape: f32[8,1], index: 2, kind: input, shape index: {}]   ;;  %s989_s5 = inlined_call_operand.vmem [shape: f32[2,1], index: 5, kind: input, shape index: {}]   ;;  %s990_s3 = inlined_call_operand.vmem [shape: f32[512,2], index: 3, kind: input, shape index: {}]   ;;  %s991_s4 = inlined_call_operand.vmem [shape: f32[2,8], index: 4, kind: input, shape index: {}]   ;;  %s992_s6 = inlined_call_operand.vmem [shape: f32[2,2], index: 6, kind: output, shape index: {}]  }
   0x1   :  { %v25_v0 = vld [vmem:[%s986_s0 + $0x8] sm:$0xff]  ;;  %v27_v2 = vld [vmem:[%s986_s0 + $0x18] sm:$0xff]  ;;  %127 = vmatprep.mubr.f32.mxu0 %v673_v3  ;;  %198 = vmatprep.mubr.f32.mxu1 %v673_v3  ;;  %v24_v6 = vld [vmem:[%s986_s0] sm:$0xff]  ;;  %vm46_vm3 = vcmask 220160   ;;  %vm676_vm4 = vmmov 0   ;;  %vm420_vm5 = vcmask 64512  }
   0x2   :  { %v29_v1 = vld [vmem:[%s986_s0 + $0x28] sm:$0xff]  ;;  %v31_v5 = vld [vmem:[%s986_s0 + $0x38] sm:$0xff]  ;;  %v28_v7 = vld [vmem:[%s986_s0 + $0x20] sm:$0xff]  ;;  %672 = vset.pattern.permute.xlu0 %v674_v8  ;;  %vm494_vm6 = vcmask 9216  }
   0x3   :  { %v584_v4 = vpack.c.bf16 %v29_v1, %v25_v0  ;;  %v594_v9 = vpack.c.bf16 %v31_v5, %v27_v2  ;;  %v586_v10 = vpack.c.bf16 %v28_v7, %v24_v6  ;;  %v26_v11 = vld [vmem:[%s986_s0 + $0x10] sm:$0xff]  ;;  %v33_v13 = vld [vmem:[%s986_s0 + $0x48] sm:$0xff]  ;;  %vm745_vm2 = vmpackc.low %vm50_vm0, %vm675_vm1 }
   0x4   :  { %v30_v12 = vld [vmem:[%s986_s0 + $0x30] sm:$0xff]  ;;  %v37_v15 = vld [vmem:[%s986_s0 + $0x68] sm:$0x7]  ;;  %v35_v17 = vld [vmem:[%s986_s0 + $0x58] sm:$0xff] }
   0x5   :  { %585 = vmatprep.subr.bf16.mxu0 %v584_v4  ;;  %v596_v14 = vpack.c.bf16 %v30_v12, %v26_v11  ;;  %595 = vmatprep.subr.bf16.mxu1 %v594_v9  ;;  %v588_v18 = vpack.c.bf16 %v37_v15, %v33_v13  ;;  %v39_v19 = vld [vmem:[%s986_s0 + $0x78] sm:$0x7]  ;;  %v32_v20 = vld [vmem:[%s986_s0 + $0x40] sm:$0xff]  ;;  %v34_v24 = vld [vmem:[%s986_s0 + $0x50] sm:$0xff] }
   0x6   :  { %587 = vmatpush1.bf16.msra.mxu0 %v586_v10  ;;  %v36_v21 = vld [vmem:[%s986_s0 + $0x60] sm:$0x7]  ;;  %v598_v22 = vpack.c.bf16 %v39_v19, %v35_v17  ;;  %v38_v25 = vld [vmem:[%s986_s0 + $0x70] sm:$0x7]  ;;  %v226_v31 = vld [vmem:[%s990_s3 + $0x88] sm:$0xff] }
   0x7   :  { %597 = vmatpush1.bf16.msra.mxu1 %v596_v14  ;;  %v591_v23 = vpack.c.bf16 %v36_v21, %v32_v20  ;;  %590 = vmatprep.subr.msk.bf16.mxu0 %vm745_vm2, %v588_v18  ;;  %v601_v26 = vpack.c.bf16 %v38_v25, %v34_v24  ;;  %v23_v27 = vld [vmem:[%s987_s1] sm:$0xff]  ;;  %v258_v33 = vld [vmem:[%s990_s3 + $0x188] sm:$0xff]  ;;  %v227_v41 = vld [vmem:[%s990_s3 + $0x90] sm:$0xff] }
   0x8   :  { %v40_v28 = vld [vmem:[%s988_s2] sm:$0xff]  ;;  %600 = vmatprep.subr.msk.bf16.mxu1 %vm745_vm2, %v598_v22  ;;  %v210_v37 = vld [vmem:[%s990_s3 + $0x8] sm:$0xff]  ;;  %v228_v42 = vld [vmem:[%s990_s3 + $0x98] sm:$0xff] }
   0x9   :  { %v414_v29 = vld [vmem:[%s989_s5] sm:$0x3]  ;;  %43 = vperm.xlu0 %672, %v40_v28   ;;  %v242_v40 = vld [vmem:[%s990_s3 + $0x108] sm:$0xff]  ;;  %v608_v44 = vpack.c.bf16 %v228_v42, %v227_v41  ;;  %v259_v45 = vld [vmem:[%s990_s3 + $0x190] sm:$0xff] }
   0xa   :  { %v225_v30 = vld [vmem:[%s990_s3 + $0x80] sm:$0xff]  ;;  %593 = vmatpush1.bf16.msk.msra.mxu0 %vm745_vm2, %v591_v23  ;;  %v260_v46 = vld [vmem:[%s990_s3 + $0x198] sm:$0xff]  ;;  %v211_v47 = vld [vmem:[%s990_s3 + $0x10] sm:$0xff] }
   0xb   :  { %v257_v32 = vld [vmem:[%s990_s3 + $0x180] sm:$0xff]  ;;  %v604_v34 = vpack.c.bf16 %v226_v31, %v225_v30  ;;  %603 = vmatpush1.bf16.msk.msra.mxu1 %vm745_vm2, %v601_v26  ;;  %v640_v48 = vpack.c.bf16 %v260_v46, %v259_v45  ;;  %v212_v49 = vld [vmem:[%s990_s3 + $0x18] sm:$0xff]  ;;  %v243_v50 = vld [vmem:[%s990_s3 + $0x110] sm:$0xff] }
   0xc   :  { %v636_v35 = vpack.c.bf16 %v258_v33, %v257_v32  ;;  %v209_v36 = vld [vmem:[%s990_s3] sm:$0xff]  ;;  %v244_v51 = vld [vmem:[%s990_s3 + $0x118] sm:$0xff]  ;;  %v610_v52 = vpack.c.bf16 %v212_v49, %v211_v47  ;;  %v230_v54 = vld [vmem:[%s990_s3 + $0xa8] sm:$0xff] }
   0xd   :  { %v241_v38 = vld [vmem:[%s990_s3 + $0x100] sm:$0xff]  ;;  %v606_v39 = vpack.c.bf16 %v210_v37, %v209_v36  ;;  %605 = vmatprep.subr.bf16.mxu0 %v604_v34  ;;  %502 = vmatmul.mubr.msk.f32.vlgmr.msra.gmra.mrb[0].mxu0 %vm46_vm3, %v23_v27  ;;  %v642_v56 = vpack.c.bf16 %v244_v51, %v243_v50  ;;  %v262_v58 = vld [vmem:[%s990_s3 + $0x1a8] sm:$0xff]  ;;  %v231_v0 = vld [vmem:[%s990_s3 + $0xb0] sm:$0xff] }
   0xe   :  { %637 = vmatprep.subr.bf16.mxu1 %v636_v35  ;;  %v638_v43 = vpack.c.bf16 %v242_v40, %v241_v38  ;;  %417 = vperm.xlu0 %672, %v414_v29   ;;  %v229_v53 = vld [vmem:[%s990_s3 + $0xa0] sm:$0xff]  ;;  %v214_v60 = vld [vmem:[%s990_s3 + $0x28] sm:$0xff]  ;;  %v232_v1 = vld [vmem:[%s990_s3 + $0xb8] sm:$0xff] }
   0xf   :  { %505 = vmatmul.mubr.msk.f32.vlgmr.msra.gmra.mrb[0].mxu1 %vm46_vm3, %v23_v27  ;;  %607 = vmatpush3.bf16.msra.mxu0 %v606_v39  ;;  %v261_v55 = vld [vmem:[%s990_s3 + $0x1a0] sm:$0xff]  ;;  %v612_v57 = vpack.c.bf16 %v230_v54, %v229_v53  ;;  %v246_v63 = vld [vmem:[%s990_s3 + $0x128] sm:$0xff]  ;;  %v263_v2 = vld [vmem:[%s990_s3 + $0x1b0] sm:$0xff]  ;;  %v616_v7 = vpack.c.bf16 %v232_v1, %v231_v0 }
  0x10   :  { %639 = vmatpush3.bf16.msra.mxu1 %v638_v43  ;;  %609 = vmatprep.subr.bf16.mxu0 %v608_v44  ;;  %v213_v59 = vld [vmem:[%s990_s3 + $0x20] sm:$0xff]  ;;  %v644_v61 = vpack.c.bf16 %v262_v58, %v261_v55  ;;  %v264_v4 = vld [vmem:[%s990_s3 + $0x1b8] sm:$0xff]  ;;  %v215_v8 = vld [vmem:[%s990_s3 + $0x30] sm:$0xff] }
  0x11   :  { %641 = vmatprep.subr.bf16.mxu1 %v640_v48  ;;  %v245_v62 = vld [vmem:[%s990_s3 + $0x120] sm:$0xff]  ;;  %v614_v5 = vpack.c.bf16 %v214_v60, %v213_v59  ;;  %v216_v9 = vld [vmem:[%s990_s3 + $0x38] sm:$0xff]  ;;  %v247_v10 = vld [vmem:[%s990_s3 + $0x130] sm:$0xff]  ;;  %v648_v11 = vpack.c.bf16 %v264_v4, %v263_v2 }
  0x12   :  { %v646_v6 = vpack.c.bf16 %v246_v63, %v245_v62  ;;  %v248_v12 = vld [vmem:[%s990_s3 + $0x138] sm:$0xff]  ;;  %v233_v13 = vld [vmem:[%s990_s3 + $0xc0] sm:$0xff]  ;;  %v234_v14 = vld [vmem:[%s990_s3 + $0xc8] sm:$0xff]  ;;  %v618_v17 = vpack.c.bf16 %v216_v9, %v215_v8 }
  0x13   :  { %611 = vmatpush3.bf16.msra.mxu0 %v610_v52  ;;  %v265_v15 = vld [vmem:[%s990_s3 + $0x1c0] sm:$0xff]  ;;  %v266_v16 = vld [vmem:[%s990_s3 + $0x1c8] sm:$0xff]  ;;  %v650_v18 = vpack.c.bf16 %v248_v12, %v247_v10  ;;  %v620_v19 = vpack.c.bf16 %v234_v14, %v233_v13  ;;  %v235_v25 = vld [vmem:[%s990_s3 + $0xd0] sm:$0xff] }
  0x14   :  { %643 = vmatpush3.bf16.msra.mxu1 %v642_v56  ;;  %613 = vmatprep.subr.bf16.mxu0 %v612_v57  ;;  %v217_v20 = vld [vmem:[%s990_s3 + $0x40] sm:$0xff]  ;;  %v218_v21 = vld [vmem:[%s990_s3 + $0x48] sm:$0xff]  ;;  %v652_v23 = vpack.c.bf16 %v266_v16, %v265_v15  ;;  %v236_v26 = vld [vmem:[%s990_s3 + $0xd8] sm:$0xff] }
  0x15   :  { %645 = vmatprep.subr.bf16.mxu1 %v644_v61  ;;  %v249_v22 = vld [vmem:[%s990_s3 + $0x140] sm:$0xff]  ;;  %v250_v24 = vld [vmem:[%s990_s3 + $0x148] sm:$0xff]  ;;  %v267_v27 = vld [vmem:[%s990_s3 + $0x1d0] sm:$0xff]  ;;  %v622_v29 = vpack.c.bf16 %v218_v21, %v217_v20  ;;  %v624_v31 = vpack.c.bf16 %v236_v26, %v235_v25 }
  0x16   :  { %v268_v28 = vld [vmem:[%s990_s3 + $0x1d8] sm:$0xff]  ;;  %v654_v30 = vpack.c.bf16 %v250_v24, %v249_v22  ;;  %v219_v32 = vld [vmem:[%s990_s3 + $0x50] sm:$0xff]  ;;  %v237_v37 = vld [vmem:[%s990_s3 + $0xe0] sm:$0xff] }
  0x17   :  { %615 = vmatpush3.bf16.msra.mxu0 %v614_v5  ;;  %v220_v33 = vld [vmem:[%s990_s3 + $0x58] sm:$0xff]  ;;  %v251_v34 = vld [vmem:[%s990_s3 + $0x150] sm:$0xff]  ;;  %v656_v35 = vpack.c.bf16 %v268_v28, %v267_v27  ;;  %v238_v38 = vld [vmem:[%s990_s3 + $0xe8] sm:$0xff] }
  0x18   :  { %647 = vmatpush3.bf16.msra.mxu1 %v646_v6  ;;  %617 = vmatprep.subr.bf16.mxu0 %v616_v7  ;;  %v252_v36 = vld [vmem:[%s990_s3 + $0x158] sm:$0xff]  ;;  %v269_v39 = vld [vmem:[%s990_s3 + $0x1e0] sm:$0xff]  ;;  %v270_v40 = vld [vmem:[%s990_s3 + $0x1e8] sm:$0xff]  ;;  %v626_v41 = vpack.c.bf16 %v220_v33, %v219_v32  ;;  %v628_v43 = vpack.c.bf16 %v238_v38, %v237_v37 }
  0x19   :  { %649 = vmatprep.subr.bf16.mxu1 %v648_v11  ;;  %v658_v42 = vpack.c.bf16 %v252_v36, %v251_v34  ;;  %v660_v44 = vpack.c.bf16 %v270_v40, %v269_v39  ;;  %v221_v45 = vld [vmem:[%s990_s3 + $0x60] sm:$0xff]  ;;  %v222_v46 = vld [vmem:[%s990_s3 + $0x68] sm:$0xff]  ;;  %v239_v51 = vld [vmem:[%s990_s3 + $0xf0] sm:$0xff] }
  0x1a   :  { %v253_v47 = vld [vmem:[%s990_s3 + $0x160] sm:$0xff]  ;;  %v630_v48 = vpack.c.bf16 %v222_v46, %v221_v45  ;;  %v254_v49 = vld [vmem:[%s990_s3 + $0x168] sm:$0xff]  ;;  %v240_v52 = vld [vmem:[%s990_s3 + $0xf8] sm:$0xff] }
  0x1b   :  { %619 = vmatpush3.bf16.msra.mxu0 %v618_v17  ;;  %v662_v50 = vpack.c.bf16 %v254_v49, %v253_v47  ;;  %v271_v53 = vld [vmem:[%s990_s3 + $0x1f0] sm:$0xff]  ;;  %v632_v54 = vpack.c.bf16 %v240_v52, %v239_v51  ;;  %v272_v55 = vld [vmem:[%s990_s3 + $0x1f8] sm:$0xff]  ;;  %v413_v20 = vld [vmem:[%s991_s4] sm:$0x3] }
  0x1c   :  { %651 = vmatpush3.bf16.msra.mxu1 %v650_v18  ;;  %621 = vmatprep.subr.bf16.mxu0 %v620_v19  ;;  %v223_v56 = vld [vmem:[%s990_s3 + $0x70] sm:$0xff]  ;;  %v224_v57 = vld [vmem:[%s990_s3 + $0x78] sm:$0xff]  ;;  %v664_v58 = vpack.c.bf16 %v272_v55, %v271_v53 }
  0x1d   :  { %653 = vmatprep.subr.bf16.mxu1 %v652_v23  ;;  %v634_v59 = vpack.c.bf16 %v224_v57, %v223_v56  ;;  %v255_v60 = vld [vmem:[%s990_s3 + $0x170] sm:$0xff]  ;;  %v256_v61 = vld [vmem:[%s990_s3 + $0x178] sm:$0xff] }
  0x1e   :  { %v666_v62 = vpack.c.bf16 %v256_v61, %v255_v60 }
  0x1f   :  { %623 = vmatpush3.bf16.msra.mxu0 %v622_v29 }
  0x20   :  { %655 = vmatpush3.bf16.msra.mxu1 %v654_v30  ;;  %625 = vmatprep.subr.bf16.mxu0 %v624_v31 }
  0x21   :  { %657 = vmatprep.subr.bf16.mxu1 %v656_v35 }
  0x23   :  { %627 = vmatpush3.bf16.msra.mxu0 %v626_v41 }
  0x24   :  { %659 = vmatpush3.bf16.msra.mxu1 %v658_v42  ;;  %629 = vmatprep.subr.bf16.mxu0 %v628_v43 }
  0x25   :  { %661 = vmatprep.subr.bf16.mxu1 %v660_v44 }
  0x27   :  { %631 = vmatpush3.bf16.msra.mxu0 %v630_v48 }
  0x28   :  { %663 = vmatpush3.bf16.msra.mxu1 %v662_v50  ;;  %633 = vmatprep.subr.bf16.mxu0 %v632_v54 }
  0x29   :  { %665 = vmatprep.subr.bf16.mxu1 %v664_v58 }
  0x2b   :  { %635 = vmatpush3.bf16.msra.mxu0 %v634_v59 }
  0x2c   :  { %667 = vmatpush3.bf16.msra.mxu1 %v666_v62  ;;  %579 = vmatprep.subr.mxu0 %v673_v3 }
  0x88   :  { %v44_v63 = vpop.permute.xlu0 %43 }
  0x8d   :  { %v418_v21 = vpop.permute.xlu0 %417 }
  0xe0   :  { %v129_v0 = vpop.f32.mrb[0].mxu0 }
  0xe1   :  { %v130_v1 = vadd.f32 %v129_v0, %v44_v63  ;;  %v131_v4 = vpop.f32.mrb[1].mxu0 }
  0xe2   :  { %v200_v2 = vpop.f32.mrb[0].mxu1  ;;  %v132_v6 = vadd.f32 %v131_v4, %v44_v63 }
  0xe3   :  { %v201_v5 = vadd.f32 %v200_v2, %v44_v63  ;;  %v202_v7 = vpop.f32.mrb[1].mxu1  ;;  %v205_v10 = vmax.f32 %v130_v1, 0.0 }
  0xe4   :  { %v203_v8 = vadd.f32 %v202_v7, %v44_v63  ;;  %v206_v9 = vmax.f32 %v132_v6, 0.0 }
  0xe5   :  { %v207_v12 = vmax.f32 %v201_v5, 0.0 }
  0xe6   :  { %v208_v11 = vmax.f32 %v203_v8, 0.0  ;;  %337 = vmatprep.mubr.f32.mxu0 %v206_v9 }
  0xe7   :  { %338 = vmatmul.mubr.f32.vlgmr.msra.gmra.mrb[2].mxu0 %v205_v10 }
  0xe8   :  { %407 = vmatprep.mubr.f32.mxu1 %v208_v11  ;;  %581 = vmatprep.mubr.msk.f32.mxu0 %vm676_vm4, %v673_v3 }
  0xe9   :  { %408 = vmatmul.mubr.f32.vlgmr.msra.gmra.mrb[2].mxu1 %v207_v12 }
 0x1ba   :  { %v539_v13 = vpop.f32.mrb[2].mxu0 }
 0x1bb   :  { %v540_v15 = vpop.f32.mrb[3].mxu0 }
 0x1bc   :  { %v574_v14 = vpop.f32.mrb[2].mxu1  ;;  %v541_v16 = vadd.f32 %v540_v15, %v539_v13 }
 0x1bd   :  { %v575_v17 = vpop.f32.mrb[3].mxu1 }
 0x1be   :  { %v576_v18 = vadd.f32 %v575_v17, %v574_v14 }
 0x1c0   :  { %v410_v19 = vadd.f32 %v576_v18, %v541_v16 }
 0x1c2   :  { %580 = vmatpush3.msra.mxu0 %v410_v19 }
 0x1c3   :  { %582 = vmatmul.mubr.msk.f32.vlgmr.msra.gmra.mrb[4].mxu0 %vm420_vm5, %v413_v20 }
 0x296   :  { %v490_v22 = vpop.f32.mrb[4].mxu0 }
 0x297   :  { %v491_v23 = vadd.f32 %v490_v22, %v418_v21  ;;  %v583_v24 = vpop.f32.mrb[5].mxu0 }
 0x299   :  { %495 = vst.msk [vmem:[%s992_s6] sm:$0x3] %vm494_vm6, %v491_v23 }

</bundles_post_ra>
